<compile_context>
chip_gen: v7x
topology: tpu7x:2x2x1
jax: 0.10.0
libtpu: 0.0.40
codegen_flags: <defaults>
</compile_context>

<pallas_src>
import jax
import jax.numpy as jnp
from jax.experimental import pallas as pl
from jax.experimental.pallas import tpu as pltpu


def conv_bn_relu_kernel(x_ref, w_ref, scale_ref, shift_ref, o_ref):
    # x_ref:     (H+2, (W+2)*Cin)       bf16  padded image (one batch elem), (w, cin) packed in lanes
    # w_ref:     (3, (W+2)*Cin, W*Cout) bf16  banded im2col weights, one slab per kh
    # scale_ref: (1, W*Cout)            f32   folded BN scale, tiled over w
    # shift_ref: (1, W*Cout)            f32   folded BN shift, tiled over w
    # o_ref:     (TH, W*Cout)           f32   lane-dense output tile (output rows h*TH .. h*TH+TH-1)
    TH = o_ref.shape[0]
    h = pl.program_id(1)
    row0 = pl.multiple_of(h * TH, TH)
    xin = x_ref[pl.ds(row0, TH + 2), :]                       # (TH+2, (W+2)*Cin)

    # 3x3 conv: kw and cin are contracted inside each matmul (K = (W+2)*Cin); the
    # 3 kh taps are a short unrolled accumulation.  No slices/reshapes that relayout.
    acc = jnp.dot(xin[0:TH, :], w_ref[0], preferred_element_type=jnp.float32)
    acc = acc + jnp.dot(xin[1:TH + 1, :], w_ref[1], preferred_element_type=jnp.float32)
    acc = acc + jnp.dot(xin[2:TH + 2, :], w_ref[2], preferred_element_type=jnp.float32)

    # Folded BatchNorm (eval mode) + ReLU, f32 epilogue; full-lane-width store.
    o_ref[...] = jnp.maximum(acc * scale_ref[...] + shift_ref[...], 0.0).astype(o_ref.dtype)


@jax.jit
def conv_bn_relu(x_nchw, weight_oihw, conv_bias, bn_gamma, bn_beta, bn_mean, bn_var,
                 eps=1e-5):
    """ConvBNRelu forward. x_nchw: (N, Cin, H, W). Returns (N, Cout, H, W)."""
    N, Cin, H, W = x_nchw.shape
    Cout = weight_oihw.shape[0]
    TH = 8 if H % 8 == 0 else H                     # H tile: multiple of 8 sublanes
    grid = (N, H // TH)
    WC = W * Cout                                   # output lane width (128 at test shapes)
    R = (W + 2) * Cin                               # contraction depth per kh matmul

    # ---- wrapper glue (fused by XLA under jit) ----------------------------------
    # NCHW -> NHWC, pad=1 spatially, cast to bf16, pack (w, cin) into the lane dim.
    x = jnp.transpose(x_nchw, (0, 2, 3, 1))
    x = jnp.pad(x, ((0, 0), (1, 1), (1, 1), (0, 0)))
    x = x.astype(jnp.bfloat16).reshape(N, H + 2, R)

    # Banded im2col weights: Wband[kh, (w+kw)*Cin + ci, w*Cout + co] = w[kh, kw, ci, co].
    w_hwio = jnp.transpose(weight_oihw, (2, 3, 1, 0)).astype(jnp.float32)   # (3,3,Cin,Cout)
    blk = w_hwio.reshape(3, 3 * Cin, Cout)                                  # (3, 3Cin, Cout), j=kw*Cin+ci
    r_idx = jnp.arange(R)
    tgt = jnp.arange(W)[:, None] * Cin + jnp.arange(3 * Cin)[None, :]       # (W, 3Cin)
    ind = (r_idx[:, None, None] == tgt[None, :, :]).astype(jnp.float32)     # (R, W, 3Cin)
    w_band = jnp.einsum("rwj,kjc->krwc", ind, blk).reshape(3, R, WC)
    w_band = w_band.astype(jnp.bfloat16)

    # Folded BN (eval mode), kept f32, tiled to the (w, cout) lane layout.
    scale = (bn_gamma / jnp.sqrt(bn_var + eps)).astype(jnp.float32)         # (Cout,)
    shift = (bn_beta + (conv_bias - bn_mean) * scale).astype(jnp.float32)   # (Cout,)
    scale_t = jnp.tile(scale, W).reshape(1, WC)
    shift_t = jnp.tile(shift, W).reshape(1, WC)

    flops = 2 * N * H * 3 * R * WC
    bytes_accessed = int(N * (H + 2) * R * 2 + 3 * R * WC * 2 + 2 * WC * 4 + N * H * WC * 4)

    out = pl.pallas_call(
        conv_bn_relu_kernel,
        out_shape=jax.ShapeDtypeStruct((N, H, WC), jnp.float32),
        grid_spec=pltpu.PrefetchScalarGridSpec(
            num_scalar_prefetch=0,
            grid=grid,
            in_specs=[
                # Full padded image per batch element; re-DMA'd only when n changes.
                pl.BlockSpec((None, H + 2, R), lambda n, h: (n, 0, 0)),
                # Constant-index blocks (fetched once, reused across the whole grid).
                pl.BlockSpec((3, R, WC), lambda n, h: (0, 0, 0)),
                pl.BlockSpec((1, WC), lambda n, h: (0, 0)),
                pl.BlockSpec((1, WC), lambda n, h: (0, 0)),
            ],
            out_specs=pl.BlockSpec((None, TH, WC), lambda n, h: (n, h, 0)),
        ),
        compiler_params=pltpu.CompilerParams(
            dimension_semantics=("parallel", "parallel"),
            vmem_limit_bytes=32 * 1024 * 1024,
        ),
        cost_estimate=pl.CostEstimate(
            flops=flops, transcendentals=0, bytes_accessed=bytes_accessed),
    )(x, w_band, scale_t, shift_t)

    # Back to the module's NCHW convention.
    out = out.reshape(N, H, W, Cout)
    return jnp.transpose(out, (0, 3, 1, 2))


def reference(x_nchw, weight_oihw, conv_bias, bn_gamma, bn_beta, bn_mean, bn_var, eps=1e-5):
    y = jax.lax.conv_general_dilated(
        x_nchw.astype(jnp.float32), weight_oihw.astype(jnp.float32),
        window_strides=(1, 1), padding=((1, 1), (1, 1)),
        dimension_numbers=("NCHW", "OIHW", "NCHW"))
    y = y + conv_bias.reshape(1, -1, 1, 1)
    y = (y - bn_mean.reshape(1, -1, 1, 1)) / jnp.sqrt(bn_var.reshape(1, -1, 1, 1) + eps)
    y = y * bn_gamma.reshape(1, -1, 1, 1) + bn_beta.reshape(1, -1, 1, 1)
    return jnp.maximum(y, 0.0)


if __name__ == "__main__":
    # ConvBNRelu(cin=4, cout=8, k=3, s=1) -> pad=1
    N, Cin, Cout, H, W = 2, 4, 8, 16, 16

    key = jax.random.PRNGKey(0)
    kx, kw_, kb, kg, kbe, km, kv = jax.random.split(key, 7)

    x = jax.random.normal(kx, (N, Cin, H, W), dtype=jnp.float32)
    weight = jax.random.normal(kw_, (Cout, Cin, 3, 3), dtype=jnp.float32) * 0.1
    conv_bias = jax.random.normal(kb, (Cout,), dtype=jnp.float32) * 0.1
    # BatchNorm2d parameters (eval-mode / folded running statistics)
    bn_gamma = 1.0 + 0.1 * jax.random.normal(kg, (Cout,), dtype=jnp.float32)
    bn_beta = 0.1 * jax.random.normal(kbe, (Cout,), dtype=jnp.float32)
    bn_mean = 0.1 * jax.random.normal(km, (Cout,), dtype=jnp.float32)
    bn_var = jnp.abs(1.0 + 0.1 * jax.random.normal(kv, (Cout,), dtype=jnp.float32))

    out = conv_bn_relu(x, weight, conv_bias, bn_gamma, bn_beta, bn_mean, bn_var)
    out = jax.block_until_ready(out)

    ref = reference(x, weight, conv_bias, bn_gamma, bn_beta, bn_mean, bn_var)
    assert out.shape == (N, Cout, H, W)
    # bf16 matmul operands (f32 accumulation) -> tolerance loosened vs the pure-f32 version.
    assert jnp.allclose(out, ref, atol=1e-1, rtol=1e-1), "mismatch vs reference"

    print("KERNEL_OK")
</pallas_src>

<mosaic_0001>
module attributes {stable_mosaic.version = 11 : i64} {
  func.func @conv_bn_relu_kernel(%arg0: i32, %arg1: i32, %arg2: memref<1x18x72xbf16, #tpu.memory_space<vmem>>, %arg3: memref<3x72x128xbf16, #tpu.memory_space<vmem>>, %arg4: memref<1x128xf32, #tpu.memory_space<vmem>>, %arg5: memref<1x128xf32, #tpu.memory_space<vmem>>, %arg6: memref<1x8x128xf32, #tpu.memory_space<vmem>>) attributes {dimension_semantics = [#tpu.dimension_semantics<parallel>, #tpu.dimension_semantics<parallel>], iteration_bounds = array<i64: 2, 2>, scalar_prefetch = 0 : i64, scratch_operands = 0 : i64, tpu.core_type = #tpu.core_type<tc>, window_params = [{transform_indices = @transform_0, window_bounds = array<i64: 1, 18, 72>}, {pipeline_mode = #tpu.pipeline_mode<synchronous>, transform_indices = @transform_1, window_bounds = array<i64: 3, 72, 128>}, {pipeline_mode = #tpu.pipeline_mode<synchronous>, transform_indices = @transform_2, window_bounds = array<i64: 1, 128>}, {pipeline_mode = #tpu.pipeline_mode<synchronous>, transform_indices = @transform_3, window_bounds = array<i64: 1, 128>}, {transform_indices = @transform_4, window_bounds = array<i64: 1, 8, 128>}]} {
    %c8_i32 = arith.constant 8 : i32
    %0 = arith.muli %arg1, %c8_i32 : i32
    %1 = tpu.assume_multiple %0, 8 : i32
    %c0 = arith.constant 0 : index
    %2 = arith.index_cast %1 : i32 to index
    %c0_0 = arith.constant 0 : index
    %3 = vector.load %arg2[%c0, %2, %c0_0] : memref<1x18x72xbf16, #tpu.memory_space<vmem>>, vector<1x10x72xbf16>
    %4 = vector.shape_cast %3 : vector<1x10x72xbf16> to vector<10x72xbf16>
    %5 = vector.extract_strided_slice %4 {offsets = [0, 0], sizes = [8, 72], strides = [1, 1]} : vector<10x72xbf16> to vector<8x72xbf16>
    %c0_1 = arith.constant 0 : index
    %c0_2 = arith.constant 0 : index
    %c0_3 = arith.constant 0 : index
    %6 = vector.load %arg3[%c0_1, %c0_2, %c0_3] : memref<3x72x128xbf16, #tpu.memory_space<vmem>>, vector<1x72x128xbf16>
    %7 = vector.shape_cast %6 : vector<1x72x128xbf16> to vector<72x128xbf16>
    %cst = arith.constant dense<0.000000e+00> : vector<8x128xf32>
    %8 = tpu.matmul %5, %7, %cst {dimension_numbers = #tpu.dot_dimension_numbers<[1], [0], [0], [1], [0, 0, 1, 1], [], []>} : vector<8x72xbf16>, vector<72x128xbf16>, vector<8x128xf32> -> vector<8x128xf32>
    %9 = vector.extract_strided_slice %4 {offsets = [1, 0], sizes = [8, 72], strides = [1, 1]} : vector<10x72xbf16> to vector<8x72xbf16>
    %c1 = arith.constant 1 : index
    %c0_4 = arith.constant 0 : index
    %c0_5 = arith.constant 0 : index
    %10 = vector.load %arg3[%c1, %c0_4, %c0_5] : memref<3x72x128xbf16, #tpu.memory_space<vmem>>, vector<1x72x128xbf16>
    %11 = vector.shape_cast %10 : vector<1x72x128xbf16> to vector<72x128xbf16>
    %cst_6 = arith.constant dense<0.000000e+00> : vector<8x128xf32>
    %12 = tpu.matmul %9, %11, %cst_6 {dimension_numbers = #tpu.dot_dimension_numbers<[1], [0], [0], [1], [0, 0, 1, 1], [], []>} : vector<8x72xbf16>, vector<72x128xbf16>, vector<8x128xf32> -> vector<8x128xf32>
    %13 = arith.addf %8, %12 : vector<8x128xf32>
    %14 = vector.extract_strided_slice %4 {offsets = [2, 0], sizes = [8, 72], strides = [1, 1]} : vector<10x72xbf16> to vector<8x72xbf16>
    %c2 = arith.constant 2 : index
    %c0_7 = arith.constant 0 : index
    %c0_8 = arith.constant 0 : index
    %15 = vector.load %arg3[%c2, %c0_7, %c0_8] : memref<3x72x128xbf16, #tpu.memory_space<vmem>>, vector<1x72x128xbf16>
    %16 = vector.shape_cast %15 : vector<1x72x128xbf16> to vector<72x128xbf16>
    %cst_9 = arith.constant dense<0.000000e+00> : vector<8x128xf32>
    %17 = tpu.matmul %14, %16, %cst_9 {dimension_numbers = #tpu.dot_dimension_numbers<[1], [0], [0], [1], [0, 0, 1, 1], [], []>} : vector<8x72xbf16>, vector<72x128xbf16>, vector<8x128xf32> -> vector<8x128xf32>
    %18 = arith.addf %13, %17 : vector<8x128xf32>
    %c0_10 = arith.constant 0 : index
    %c0_11 = arith.constant 0 : index
    %19 = vector.load %arg4[%c0_10, %c0_11] : memref<1x128xf32, #tpu.memory_space<vmem>>, vector<1x128xf32>
    %20 = vector.broadcast %19 : vector<1x128xf32> to vector<8x128xf32>
    %21 = arith.mulf %18, %20 : vector<8x128xf32>
    %c0_12 = arith.constant 0 : index
    %c0_13 = arith.constant 0 : index
    %22 = vector.load %arg5[%c0_12, %c0_13] : memref<1x128xf32, #tpu.memory_space<vmem>>, vector<1x128xf32>
    %23 = vector.broadcast %22 : vector<1x128xf32> to vector<8x128xf32>
    %24 = arith.addf %21, %23 : vector<8x128xf32>
    %cst_14 = arith.constant 0.000000e+00 : f32
    %25 = vector.broadcast %cst_14 : f32 to vector<8x128xf32>
    %26 = arith.maximumf %24, %25 : vector<8x128xf32>
    %c0_15 = arith.constant 0 : index
    %c0_16 = arith.constant 0 : index
    %c0_17 = arith.constant 0 : index
    %27 = vector.load %arg6[%c0_15, %c0_16, %c0_17] : memref<1x8x128xf32, #tpu.memory_space<vmem>>, vector<1x8x128xf32>
    %28 = vector.shape_cast %27 : vector<1x8x128xf32> to vector<8x128xf32>
    %29 = vector.shape_cast %26 : vector<8x128xf32> to vector<1x8x128xf32>
    tpu.vector_store %arg6[%c0_15, %c0_16, %c0_17], %29 {strides = array<i32>} : memref<1x8x128xf32, #tpu.memory_space<vmem>>, vector<1x8x128xf32>,
    return
  }
  func.func @transform_0(%arg0: i32, %arg1: i32) -> (i32, i32, i32) {
    %c0_i32 = arith.constant 0 : i32
    %c0_i32_0 = arith.constant 0 : i32
    %c0_i32_1 = arith.constant 0 : i32
    return %arg0, %c0_i32, %c0_i32_0 : i32, i32, i32
  }
  func.func @transform_1(%arg0: i32, %arg1: i32) -> (i32, i32, i32) {
    %c0_i32 = arith.constant 0 : i32
    %c0_i32_0 = arith.constant 0 : i32
    %c0_i32_1 = arith.constant 0 : i32
    %c0_i32_2 = arith.constant 0 : i32
    return %c0_i32, %c0_i32_0, %c0_i32_1 : i32, i32, i32
  }
  func.func @transform_2(%arg0: i32, %arg1: i32) -> (i32, i32) {
    %c0_i32 = arith.constant 0 : i32
    %c0_i32_0 = arith.constant 0 : i32
    %c0_i32_1 = arith.constant 0 : i32
    return %c0_i32, %c0_i32_0 : i32, i32
  }
  func.func @transform_3(%arg0: i32, %arg1: i32) -> (i32, i32) {
    %c0_i32 = arith.constant 0 : i32
    %c0_i32_0 = arith.constant 0 : i32
    %c0_i32_1 = arith.constant 0 : i32
    return %c0_i32, %c0_i32_0 : i32, i32
  }
  func.func @transform_4(%arg0: i32, %arg1: i32) -> (i32, i32, i32) {
    %c0_i32 = arith.constant 0 : i32
    %c0_i32_0 = arith.constant 0 : i32
    return %arg0, %arg1, %c0_i32 : i32, i32, i32
  }
}

</mosaic_0001>

<bundles_post_ra>
// kernel: tile.18
= control target key start
LH: loop header
LB: loop body
LE: loop exit
PB: predicated region body
PF: predicated region fallthrough
CT: control target
= control target key end

     0   :  { %s28_s0 = inlined_call_operand.vmem [shape: f32[8], index: 0, kind: input, shape index: {}]   ;;  %s29_s1 = inlined_call_operand.vmem [shape: f32[16,8], index: 1, kind: output, shape index: {}]  }
   0x1   :  { %v4_v0 = vld [vmem:[%s28_s0] ss:$0 sm:$0xff] }
   0x2   :  { %5 = vst [vmem:[%s29_s1] sm:$0xff] %v4_v0  ;;  %8 = vst [vmem:[%s29_s1 + $0x8] sm:$0xff] %v4_v0 }

// kernel: tile.19
= control target key start
LH: loop header
LB: loop body
LE: loop exit
PB: predicated region body
PF: predicated region fallthrough
CT: control target
= control target key end

     0   :  { %s131_s10 = smov 120   ;;  %s132_s11 = smov 104   ;;  %vm3_vm0 = vcmask 64512   ;;  %vm9_vm1 = vcmask 1048512   ;;  %vm15_vm2 = vcmask 982912   ;;  %vm21_vm3 = vcmask 917312   ;;  %s207_s0 = inlined_call_operand.vmem [shape: f32[16,8], index: 0, kind: input, shape index: {}]   ;;  %s208_s1 = inlined_call_operand.vmem [shape: f32[1,128], index: 1, kind: output, shape index: {}]  }
   0x1   :  { %v101_v0 = vld [vmem:[%s207_s0 + $0xf] sm:$0x1]   ;;  %v103_v1 = vld [vmem:[%s207_s0 + $0xd] sm:$0x1]   ;;  %v102_v2 = vld [vmem:[%s207_s0 + $0xe] sm:$0x1]  }
   0x2   :  { %7 = vrot.lane.b32.xlu0 %v101_v0, %s131_s10  ;;  %19 = vrot.lane.b32.xlu1 %v103_v1, %s132_s11  ;;  %v104_v3 = vld [vmem:[%s207_s0 + $0xc] sm:$0x1]   ;;  %s133_s16 = smov 112   ;;  %s134_s17 = smov 96   ;;  %v105_v4 = vld [vmem:[%s207_s0 + $0xb] sm:$0x1]  }
   0x3   :  { %v106_v5 = vld [vmem:[%s207_s0 + $0xa] sm:$0x1]   ;;  %v2_v6 = vld [vmem:[%s207_s0] sm:$0x1]   ;;  %s135_s24 = smov 88   ;;  %s136_s25 = smov 80  }
   0x4   :  { %4 = vst.msk [vmem:[#allocation0] sm:$0x1] %vm3_vm0, %v2_v6   ;;  %v107_v7 = vld [vmem:[%s207_s0 + $0x9] sm:$0x1]   ;;  %v108_v8 = vld [vmem:[%s207_s0 + $0x8] sm:$0x1]  }
   0x5   :  { %s137_s30 = smov 72   ;;  %s138_s2 = smov 64   ;;  %v109_v9 = vld [vmem:[%s207_s0 + $0x7] sm:$0x1]   ;;  %v110_v10 = vld [vmem:[%s207_s0 + $0x6] sm:$0x1]  }
   0x6   :  { %13 = vrot.lane.b32.xlu0 %v102_v2, %s133_s16  ;;  %25 = vrot.lane.b32.xlu1 %v104_v3, %s134_s17  ;;  %s139_s7 = smov 56   ;;  %s140_s8 = smov 48   ;;  %v111_v11 = vld [vmem:[%s207_s0 + $0x5] sm:$0x1]   ;;  %v112_v12 = vld [vmem:[%s207_s0 + $0x4] sm:$0x1]  }
   0x7   :  { %s141_s13 = smov 40   ;;  %s142_s14 = smov 32   ;;  %v113_v13 = vld [vmem:[%s207_s0 + $0x3] sm:$0x1]   ;;  %v114_v14 = vld [vmem:[%s207_s0 + $0x2] sm:$0x1]  }
   0x8   :  { %s143_s19 = smov 24   ;;  %s144_s20 = smov 16   ;;  %v115_v15 = vld [vmem:[%s207_s0 + $0x1] sm:$0x1]   ;;  %vm27_vm4 = vcmask 851712   ;;  %vm33_vm5 = vcmask 786112  }
   0x9   :  { %s145_s0 = smov 8   ;;  %vm39_vm6 = vcmask 720512   ;;  %vm45_vm7 = vcmask 654912   ;;  %vm51_vm8 = vcmask 589312   ;;  %vm57_vm9 = vcmask 523712  }
   0xa   :  { %31 = vrot.lane.b32.xlu0 %v105_v4, %s135_s24  ;;  %37 = vrot.lane.b32.xlu1 %v106_v5, %s136_s25  ;;  %vm63_vm10 = vcmask 458112   ;;  %vm69_vm11 = vcmask 392512   ;;  %vm75_vm12 = vcmask 326912   ;;  %vm81_vm13 = vcmask 261312  }
   0xb   :  { %vm87_vm14 = vcmask 195712   ;;  %vm93_vm15 = vcmask 130112  }
   0xe   :  { %43 = vrot.lane.b32.xlu0 %v107_v7, %s137_s30  ;;  %49 = vrot.lane.b32.xlu1 %v108_v8, %s138_s2 }
  0x12   :  { %55 = vrot.lane.b32.xlu0 %v109_v9, %s139_s7  ;;  %61 = vrot.lane.b32.xlu1 %v110_v10, %s140_s8 }
  0x16   :  { %67 = vrot.lane.b32.xlu0 %v111_v11, %s141_s13  ;;  %73 = vrot.lane.b32.xlu1 %v112_v12, %s142_s14 }
  0x1a   :  { %79 = vrot.lane.b32.xlu0 %v113_v13, %s143_s19  ;;  %85 = vrot.lane.b32.xlu1 %v114_v14, %s144_s20 }
  0x1e   :  { %91 = vrot.lane.b32.xlu0 %v115_v15, %s145_s0 }
  0x74   :  { %v8_v16 = vpop.permute.xlu0 %7   ;;  %v20_v17 = vpop.permute.xlu1 %19  }
  0x75   :  { %10 = vst.msk [vmem:[#allocation0] sm:$0x1] %vm9_vm1, %v8_v16  }
  0x78   :  { %v14_v18 = vpop.permute.xlu0 %13   ;;  %v26_v19 = vpop.permute.xlu1 %25  }
  0x79   :  { %16 = vst.msk [vmem:[#allocation0] sm:$0x1] %vm15_vm2, %v14_v18  }
  0x7a   :  { %22 = vst.msk [vmem:[#allocation0] sm:$0x1] %vm21_vm3, %v20_v17  }
  0x7b   :  { %28 = vst.msk [vmem:[#allocation0] sm:$0x1] %vm27_vm4, %v26_v19  }
  0x7c   :  { %v32_v20 = vpop.permute.xlu0 %31   ;;  %v38_v21 = vpop.permute.xlu1 %37  }
  0x7d   :  { %34 = vst.msk [vmem:[#allocation0] sm:$0x1] %vm33_vm5, %v32_v20  }
  0x7e   :  { %40 = vst.msk [vmem:[#allocation0] sm:$0x1] %vm39_vm6, %v38_v21  }
  0x80   :  { %v44_v22 = vpop.permute.xlu0 %43   ;;  %v50_v23 = vpop.permute.xlu1 %49  }
  0x81   :  { %46 = vst.msk [vmem:[#allocation0] sm:$0x1] %vm45_vm7, %v44_v22  }
  0x82   :  { %52 = vst.msk [vmem:[#allocation0] sm:$0x1] %vm51_vm8, %v50_v23  }
  0x84   :  { %v56_v24 = vpop.permute.xlu0 %55   ;;  %v62_v25 = vpop.permute.xlu1 %61  }
  0x85   :  { %58 = vst.msk [vmem:[#allocation0] sm:$0x1] %vm57_vm9, %v56_v24  }
  0x86   :  { %64 = vst.msk [vmem:[#allocation0] sm:$0x1] %vm63_vm10, %v62_v25  }
  0x88   :  { %v68_v26 = vpop.permute.xlu0 %67   ;;  %v74_v27 = vpop.permute.xlu1 %73  }
  0x89   :  { %70 = vst.msk [vmem:[#allocation0] sm:$0x1] %vm69_vm11, %v68_v26  }
  0x8a   :  { %76 = vst.msk [vmem:[#allocation0] sm:$0x1] %vm75_vm12, %v74_v27  }
  0x8c   :  { %v80_v28 = vpop.permute.xlu0 %79   ;;  %v86_v29 = vpop.permute.xlu1 %85  }
  0x8d   :  { %82 = vst.msk [vmem:[#allocation0] sm:$0x1] %vm81_vm13, %v80_v28  }
  0x8e   :  { %88 = vst.msk [vmem:[#allocation0] sm:$0x1] %vm87_vm14, %v86_v29  }
  0x90   :  { %v92_v30 = vpop.permute.xlu0 %91  }
  0x91   :  { %94 = vst.msk [vmem:[#allocation0] sm:$0x1] %vm93_vm15, %v92_v30  }
  0x98   :  { %v98_v31 = vld [vmem:[#allocation0] sm:$0x1] }
  0x99   :  { %100 = vst [vmem:[%s208_s1] sm:$0x1] %v98_v31 }

// kernel: conv_bn_relu.1
= control target key start
LH: loop header
LB: loop body
LE: loop exit
PB: predicated region body
PF: predicated region fallthrough
CT: control target
= control target key end

     0   :  { %s832_s15 = smov 0   ;;  %s834_s16 = smov 0   ;;  %s970_s0 = inlined_call_operand.vmem [shape: bf16[2,18,72], index: 0, kind: input, shape index: {}]   ;;  %s971_s1 = inlined_call_operand.vmem [shape: bf16[3,72,128], index: 1, kind: input, shape index: {}]   ;;  %s972_s2 = inlined_call_operand.vmem [shape: f32[1,128], index: 2, kind: input, shape index: {}]   ;;  %s973_s3 = inlined_call_operand.vmem [shape: f32[1,128], index: 3, kind: input, shape index: {}]   ;;  %s974_s4 = inlined_call_operand.vmem [shape: f32[2,16,128], index: 4, kind: output, shape index: {}]  }
   0x1   :  { %s836_s17 = smov 0   ;;  %s838_s18 = smov 0  }
   0x2   :  { %s840_s19 = smov 0  }
   0x3 LB: > { %s23_s20 = sadd.s32 1, %s795_s17  ;;  %s26_s21 = sadd.s32 1, %s799_s18  ;;  %s803_s19 = sphi %s840_s19, %s14_s19   ;;  %s799_s18 = sphi %s838_s18, %s978_s18   ;;  %s795_s17 = sphi %s836_s17, %s977_s17   ;;  %s791_s16 = sphi %s834_s16, %s976_s16   ;;  %s787_s15 = sphi %s832_s15, %s975_s15  }
   0x4   : > { %p24_p0 = scmp.ge.s32.totalorder %s23_s20, 2  ;;  %p594_p1 = scmp.ge.s32.totalorder %s803_s19, 1 }
   0x5   : > { %p176_p2 = scmp.lt.s32.totalorder %s803_s19, 5 }
   0x6   : > { %s980_s20 = smov (%p24_p0, %s23_s20), 0  ;;  %s982_s21 = smov (!%p24_p0, %s26_s21), %s799_s18 }
   0x7   : > { %p177_p3 = pnand %p594_p1, %p176_p2  ;;  %p28_p4 = scmp.ge.s32.totalorder %s982_s21, 2 }
   0x8   : > { %v749_v0 = vld [vmem:[%s971_s1] sm:$0xff] (!%p177_p3)   ;;  %v805_v1 = vmov (!%p177_p3), 0.0   ;;  %v750_v2 = vld [vmem:[%s971_s1 + $0x8] sm:$0xff] (!%p177_p3)   ;;  %vm806_vm0 = vmmov (!%p177_p3), 0   ;;  %p205_p5 = scmp.lt.s32.totalorder (!%p177_p3), %s791_s16, 1  ;;  %v751_v4 = vld [vmem:[%s971_s1 + $0x10] sm:$0xff] (!%p177_p3)  }
   0x9   : > { %s984_s21 = smov (%p28_p4, %s982_s21), 0  ;;  %180 = sbr.rel (%p177_p3) target bundleno = 271 (0x10f), region = 36 }
   0xa   : > { %673 = vmatprep.subr.bf16.mxu0 (!%p177_p3), %v805_v1  ;;  %659 = vmatprep.subr.bf16.mxu1 (!%p177_p3), %v805_v1  ;;  %v754_v3 = vld [vmem:[%s971_s1 + $0x24] sm:$0xff] (!%p177_p3)   ;;  %s598_s30 = sshll.u32 (!%p177_p3), %s787_s15, 3  ;;  %v757_v5 = vld [vmem:[%s971_s1 + $0x2c] sm:$0xff] (!%p177_p3)   ;;  %v752_v6 = vld [vmem:[%s971_s1 + $0x18] sm:$0xff] (!%p177_p3)   ;;  %vm288_vm1 = vcmask (!%p177_p3), 1043456   ;;  %vm284_vm2 = vcmask (!%p177_p3), 588800  }
   0xb   : > { %674 = vmatpush3.bf16.msra.mxu0 (!%p177_p3), %v749_v0  ;;  %683 = vmatprep.mubr.msk.bf16.mxu0 (!%p177_p3), %vm806_vm0, %v805_v1  ;;  %s220_s6 = sshra.s32 (!%p177_p3), %s598_s30, 3  ;;  %v753_v7 = vld [vmem:[%s971_s1 + $0x20] ss:$0 sps:$4 sm:$0xff] (!%p177_p3)   ;;  %v759_v10 = vld [vmem:[%s971_s1 + $0x34] sm:$0xff] (!%p177_p3)   ;;  %v763_v15 = vld [vmem:[%s971_s1 + $0x44] ss:$0 sps:$4 sm:$0xff] (!%p177_p3)  }
   0xc   : > { %675 = vmatprep.subr.bf16.mxu0 (!%p177_p3), %v805_v1  ;;  %669 = vmatprep.mubr.msk.bf16.mxu1 (!%p177_p3), %vm806_vm0, %v805_v1  ;;  %s599_s7 = sshll.u32 (!%p177_p3), %s220_s6, 2  ;;  %v363_v13 = vsel (!%p177_p3), %vm288_vm1, %v753_v7, 0  ;;  %v761_v14 = vld [vmem:[%s971_s1 + $0x3c] sm:$0xff] (!%p177_p3)   ;;  %v756_v17 = vld [vmem:[%s971_s1 + $0x48] sm:$0xff] (!%p177_p3)   ;;  %v290_v19 = vsel (!%p177_p3), %vm288_vm1, %v763_v15, 0  ;;  %v758_v20 = vld [vmem:[%s971_s1 + $0x50] sm:$0xff] (!%p177_p3)  }
   0xd   : > { %660 = vmatpush3.bf16.msra.mxu1 (!%p177_p3), %v754_v3  ;;  %v760_v22 = vld [vmem:[%s971_s1 + $0x58] sm:$0xff] (!%p177_p3)   ;;  %v762_v23 = vld [vmem:[%s971_s1 + $0x60] sm:$0xff] (!%p177_p3)   ;;  %v764_v24 = vld [vmem:[%s971_s1 + $0x68] ss:$0 sps:$4 sm:$0xff] (!%p177_p3)   ;;  %p212_p6 = scmp.lt.s32.totalorder (!%p177_p3), %s787_s15, 1 }
   0xe   : > { %661 = vmatprep.subr.bf16.mxu1 (!%p177_p3), %v805_v1  ;;  %v447_v25 = vsel (!%p177_p3), %vm288_vm1, %v764_v24, 0  ;;  %v637_v32 = vld [vmem:[%s972_s2] ss:$0 sm:$0xff] (!%p177_p3) }
   0xf   : > { %676 = vmatpush3.bf16.msra.mxu0 (!%p177_p3), %v750_v2  ;;  %v638_v35 = vld [vmem:[%s973_s3] ss:$0 sm:$0xff] (!%p177_p3) }
  0x10   : > { %s986_s16 = smov (!%p205_p5, %s791_s16), 1  ;;  %677 = vmatprep.subr.bf16.mxu0 %v805_v1  ;;  %s988_s15 = smov (!%p212_p6, %s787_s15), 1 }
  0x11   : > { %s706_s5 = smul.u32 12, %s986_s16  ;;  %662 = vmatpush3.bf16.msra.mxu1 %v757_v5  ;;  %s596_s22 = sshll.u32 %s986_s16, 1 }
  0x12   : > { %663 = vmatprep.subr.bf16.mxu1 %v805_v1  ;;  %s215_s23 = sadd.s32 %s596_s22, %s988_s15 }
  0x13   : > { %s209_s14 = scalar_lea.vmem %s970_s0, %s706_s5  ;;  %678 = vmatpush3.bf16.msra.mxu0 %v751_v4  ;;  %s597_s28 = sshll.u32 %s215_s23, 3 }
  0x14   : > { %s223_s24 = scalar_lea.vmem %s209_s14, %s599_s7  ;;  %679 = vmatprep.subr.bf16.mxu0 %v805_v1  ;;  %s217_s15 = scalar_lea.vmem %s974_s4, %s597_s28 }
  0x15   : > { %v224_v8 = vld [vmem:[%s223_s24] sm:$0xf]  ;;  %v225_v9 = vld [vmem:[%s223_s24 + $0x4] sm:$0x1]  ;;  %664 = vmatpush3.bf16.msra.mxu1 %v759_v10 }
  0x16   : > { %v609_v11 = vcombine.low %v224_v8, %v225_v9  ;;  %665 = vmatprep.subr.bf16.mxu1 %v805_v1 }
  0x17   : > { %680 = vmatpush3.bf16.msra.mxu0 %v752_v6 }
  0x18   : > { %v253_v12 = vshll.u32 %v609_v11, 16  ;;  %681 = vmatprep.subr.bf16.mxu0 %v805_v1  ;;  %v251_v16 = vshrl.u32 %v609_v11, 16  ;;  %v415_v26 = vrot.slane %v609_v11, 1 }
  0x19   : > { %666 = vmatpush3.bf16.msra.mxu1 %v761_v14 }
  0x1a   : > { %v255_v18 = vrot.slane %v253_v12, 1  ;;  %667 = vmatprep.subr.bf16.mxu1 %v805_v1 }
  0x1b   : > { %682 = vmatpush3.bf16.msra.mxu0 %v363_v13 }
  0x1c   : > { %687 = vmatprep.subr.bf16.mxu0 %v805_v1  ;;  %v256_v21 = vor.u32 %v255_v18, %v251_v16 }
  0x1d   : > { %668 = vmatpush3.bf16.msra.mxu1 %v290_v19 }
  0x1e   : > { %684 = vmatmul.mubr.msk.bf16.vlgmr.msra.gmra.mrb[0].mxu0 %vm284_vm2, %v224_v8 }
  0x1f   : > { %688 = vmatpush3.bf16.msra.mxu0 %v756_v17  ;;  %697 = vmatprep.mubr.msk.bf16.mxu0 %vm806_vm0, %v805_v1 }
  0x20   : > { %689 = vmatprep.subr.bf16.mxu0 %v805_v1  ;;  %670 = vmatmul.mubr.msk.bf16.vlgmr.msra.gmra.mrb[0].mxu1 %vm284_vm2, %v256_v21 }
  0x23   : > { %690 = vmatpush3.bf16.msra.mxu0 %v758_v20 }
  0x24   : > { %691 = vmatprep.subr.bf16.mxu0 %v805_v1 }
  0x27   : > { %692 = vmatpush3.bf16.msra.mxu0 %v760_v22 }
  0x28   : > { %693 = vmatprep.subr.bf16.mxu0 %v805_v1 }
  0x2b   : > { %694 = vmatpush3.bf16.msra.mxu0 %v762_v23 }
  0x2c   : > { %695 = vmatprep.subr.bf16.mxu0 %v805_v1 }
  0x2f   : > { %696 = vmatpush3.bf16.msra.mxu0 %v447_v25 }
  0x32   : > { %698 = vmatmul.mubr.msk.bf16.vlgmr.msra.gmra.mrb[0].mxu0 %vm284_vm2, %v415_v26 }
  0xf3   : > { %v326_v27 = vpop.f32.mrb[0].mxu1 }
  0xf4   : > { %v671_v28 = vpop.f32.mrb[1].mxu1 }
  0xf5   : > { %v329_v29 = vpop.f32.mrb[2].mxu1 }
  0xf6   : > { %v672_v30 = vpop.f32.mrb[3].mxu1 }
 0x105   : > { %v483_v31 = vpop.f32.mrb[0].mxu0 }
 0x106   : > { %v701_v33 = vadd.f32 %v483_v31, %v326_v27  ;;  %v699_v34 = vpop.f32.mrb[1].mxu0 }
 0x107   : > { %v486_v36 = vpop.f32.mrb[2].mxu0 }
 0x108   : > { %v497_v37 = vmul.f32 %v701_v33, %v637_v32  ;;  %v700_v38 = vpop.f32.mrb[3].mxu0 }
 0x10a   : > { %v505_v39 = vadd.f32 %v638_v35, %v497_v37 }
 0x10c   : > { %v506_v40 = vmax.f32 %v505_v39, 0.0 }
 0x10e   : > { %507 = vst [vmem:[%s217_s15] sm:$0xff] %v506_v40 }
 0x10f PF: > { %s14_s19 = sadd.s32 1, %s803_s19   ;;  %s975_s15 = smov %s795_s17 }
 0x110   : > { %p11_p7 = scmp.ge.s32.totalorder %s14_s19, 6   ;;  %s976_s16 = smov %s799_s18 }
 0x111   : > { %s977_s17 = smov %s980_s20  ;;  %s978_s18 = smov %s984_s21 }
 0x112   :  { %13 = sbr.rel (!%p11_p7) target bundleno = 3 (0x3), region = 69 }

</bundles_post_ra>
